<compile_context>
chip_gen: v7x
topology: tpu7x:2x2x1
jax: 0.10.0
libtpu: 0.0.40
codegen_flags: <defaults>
</compile_context>

<pallas_src>
import jax
import jax.numpy as jnp
import numpy as np
from jax.experimental import pallas as pl
from jax.experimental.pallas import tpu as pltpu


# ----------------------------------------------------------------------------
# Host-side helpers: VMEM budget, tile picking, compiler params.
# ----------------------------------------------------------------------------

_VMEM_CAP = None


def _vmem_cap_bytes():
    global _VMEM_CAP
    if _VMEM_CAP is None:
        try:
            _VMEM_CAP = int(pltpu.get_tpu_info().vmem_capacity_bytes)
        except Exception:
            _VMEM_CAP = 128 << 20
    return _VMEM_CAP


def _tile_target_bytes():
    # ~4 MiB per-step operand budget on 128 MiB parts (v5e/v6e), ~2 MiB on 64 MiB (v7x).
    return max(1 << 20, _vmem_cap_bytes() // 32)


def _pick_tile(extent, bytes_per_row, *, align=8, want_steps=2):
    """Largest divisor of `extent` that is a multiple of `align` (or the full
    extent), fits the per-step byte target, and leaves >= want_steps grid steps
    when the extent allows (so the v7x megacore always has something to shard)."""
    target = _tile_target_bytes()
    cands = [d for d in range(align, extent + 1, align) if extent % d == 0]
    if extent not in cands:
        cands.append(extent)
    fit = [d for d in cands if d * bytes_per_row <= target] or [min(cands)]
    steps_ok = [d for d in fit if extent // d >= want_steps]
    return max(steps_ok) if steps_ok else max(fit)


def _block_bytes(shapes, itemsize):
    return sum(int(np.prod(s)) for s in shapes) * itemsize


def _mosaic_params(grid_rank, step_bytes):
    cap = _vmem_cap_bytes()
    limit = int(min(0.8 * cap, max(32 << 20, 3 * step_bytes + (8 << 20))))
    return pltpu.CompilerParams(
        dimension_semantics=("parallel",) * grid_rank,
        vmem_limit_bytes=limit,
    )


# ----------------------------------------------------------------------------
# Kernels.  Channels ride the lane axis everywhere; weights are pre-transposed
# (C_in, C_out) in the wrapper, biases are (1, C_out) rows.
# ----------------------------------------------------------------------------

def _swish(x):
    return x * jax.nn.sigmoid(x)


def _conv1x1_tile(x, w):
    """x: (Th, W, Cin) feature-dtype tile, w: (Cin, Cout) -> (Th, W, Cout) f32."""
    th, wt, cin = x.shape
    cout = w.shape[1]
    if wt % 8 == 0:  # layout-free leading-dim merge
        y = jnp.dot(x.reshape(th * wt, cin), w, preferred_element_type=jnp.float32)
        return y.reshape(th, wt, cout)
    wb = jnp.broadcast_to(w, (th, cin, cout))
    return jnp.einsum("twc,tcd->twd", x, wb, preferred_element_type=jnp.float32)


def _concat_conv_dual_kernel(x1_ref, x2_ref, wa_ref, wb_ref, b_ref, wn_ref,
                             mid_ref, y_ref):
    # mid = swish(x1 @ Wa + x2 @ Wb + b)   (channel-concat conv, concat never built)
    # y   = mid @ Wnext                    (reassociated product for later upsampling)
    acc = jnp.dot(x1_ref[...], wa_ref[...], preferred_element_type=jnp.float32)
    acc = acc + jnp.dot(x2_ref[...], wb_ref[...], preferred_element_type=jnp.float32)
    acc = acc + b_ref[...].astype(jnp.float32)
    mid = _swish(acc)
    mid_ref[...] = mid.astype(mid_ref.dtype)
    y_ref[...] = jnp.dot(mid.astype(x1_ref.dtype), wn_ref[...],
                         preferred_element_type=jnp.float32).astype(y_ref.dtype)


def _make_sum_conv_swish_kernel(n_in):
    # out = swish((x1 + ... + xn) @ W + b)   (BatchNorm already folded into W, b)
    def kernel(*refs):
        x_refs = refs[:n_in]
        w_ref, b_ref, o_ref = refs[n_in:]
        s = x_refs[0][...].astype(jnp.float32)
        for r in x_refs[1:]:
            s = s + r[...].astype(jnp.float32)
        s = s.astype(x_refs[0].dtype)
        acc = jnp.dot(s, w_ref[...], preferred_element_type=jnp.float32)
        acc = acc + b_ref[...].astype(jnp.float32)
        o_ref[...] = _swish(acc).astype(o_ref.dtype)
    return kernel


def _rowmix_kernel(r_ref, x_ref, o_ref):
    # o[b] = R @ x[b]: the H-axis stage of a separable resize / pool operator.
    o_ref[0] = jnp.dot(r_ref[...], x_ref[0],
                       preferred_element_type=jnp.float32).astype(o_ref.dtype)


def _up_consumer_kernel(x1_ref, ys_ref, rw_ref, wa_ref, b_ref, o_ref):
    # out = swish(conv1x1(x1; Wa) + Winterp(ys; Rw) + b)
    # ys already carries the concat-conv's second weight and the H interpolation.
    _, th, wbig, _ = x1_ref.shape
    ws = ys_ref.shape[2]
    conv = _conv1x1_tile(x1_ref[0], wa_ref[...])
    rw_b = jnp.broadcast_to(rw_ref[...], (th, wbig, ws))
    up = jnp.einsum("twk,tkc->twc", rw_b, ys_ref[0],
                    preferred_element_type=jnp.float32)
    acc = conv + up + b_ref[...].astype(jnp.float32)
    o_ref[0] = _swish(acc).astype(o_ref.dtype)


def _down_consumer_kernel(x1_ref, x2_ref, xd_ref, dw_ref, w_ref, b_ref, o_ref):
    # out = swish((x1 + x2 + Wstage(xd; Dw)) @ W + b)
    # xd already carries the H stage of the avgpool(3,2,1)+bilinear operator.
    _, th, wsm, _ = x1_ref.shape
    wbig = xd_ref.shape[2]
    dw_b = jnp.broadcast_to(dw_ref[...], (th, wsm, wbig))
    dres = jnp.einsum("twk,tkc->twc", dw_b, xd_ref[0],
                      preferred_element_type=jnp.float32)
    s = (x1_ref[0].astype(jnp.float32) + x2_ref[0].astype(jnp.float32)
         + dres).astype(x1_ref.dtype)
    acc = _conv1x1_tile(s, w_ref[...]) + b_ref[...].astype(jnp.float32)
    o_ref[0] = _swish(acc).astype(o_ref.dtype)


# ----------------------------------------------------------------------------
# pallas_call wrappers.
# ----------------------------------------------------------------------------

def _flatten_hw(x):
    b, h, w, c = x.shape
    return x.reshape(b * h * w, c)


def _concat_conv_dual(x1, x2, wa, wb, bias, wnext):
    """mid = swish(x1@wa + x2@wb + b); y = mid@wnext.  x*: (B,H,W,Cin) channels-last."""
    b, h, w, cin = x1.shape
    cout, cnext = wa.shape[1], wnext.shape[1]
    itemsize = jnp.dtype(x1.dtype).itemsize
    m = b * h * w
    tm = _pick_tile(m, (2 * cin + cout + cnext) * itemsize, align=8, want_steps=2)
    step_bytes = _block_bytes(
        [(tm, cin), (tm, cin), (cin, cout), (cin, cout), (1, cout),
         (cout, cnext), (tm, cout), (tm, cnext)], itemsize)
    mid, y = pl.pallas_call(
        _concat_conv_dual_kernel,
        out_shape=(jax.ShapeDtypeStruct((m, cout), x1.dtype),
                   jax.ShapeDtypeStruct((m, cnext), x1.dtype)),
        grid=(m // tm,),
        in_specs=[
            pl.BlockSpec((tm, cin), lambda i: (i, 0)),
            pl.BlockSpec((tm, cin), lambda i: (i, 0)),
            pl.BlockSpec((cin, cout), lambda i: (0, 0)),
            pl.BlockSpec((cin, cout), lambda i: (0, 0)),
            pl.BlockSpec((1, cout), lambda i: (0, 0)),
            pl.BlockSpec((cout, cnext), lambda i: (0, 0)),
        ],
        out_specs=[
            pl.BlockSpec((tm, cout), lambda i: (i, 0)),
            pl.BlockSpec((tm, cnext), lambda i: (i, 0)),
        ],
        compiler_params=_mosaic_params(1, step_bytes),
    )(_flatten_hw(x1), _flatten_hw(x2), wa, wb, bias, wnext)
    return mid.reshape(b, h, w, cout), y.reshape(b, h, w, cnext)


def _sum_conv_swish(xs, w, bias):
    """swish((x1 + ... + xn) @ w + b);  xs: list of (B,H,W,C) channels-last."""
    b, h, ww, cin = xs[0].shape
    cout = w.shape[1]
    n = len(xs)
    itemsize = jnp.dtype(xs[0].dtype).itemsize
    m = b * h * ww
    tm = _pick_tile(m, (n * cin + cout) * itemsize, align=8, want_steps=2)
    step_bytes = _block_bytes(
        [(tm, cin)] * n + [(cin, cout), (1, cout), (tm, cout)], itemsize)
    out = pl.pallas_call(
        _make_sum_conv_swish_kernel(n),
        out_shape=jax.ShapeDtypeStruct((m, cout), xs[0].dtype),
        grid=(m // tm,),
        in_specs=[pl.BlockSpec((tm, cin), lambda i: (i, 0)) for _ in range(n)]
        + [pl.BlockSpec((cin, cout), lambda i: (0, 0)),
           pl.BlockSpec((1, cout), lambda i: (0, 0))],
        out_specs=pl.BlockSpec((tm, cout), lambda i: (i, 0)),
        compiler_params=_mosaic_params(1, step_bytes),
    )(*[_flatten_hw(x) for x in xs], w, bias)
    return out.reshape(b, h, ww, cout)


def _rowmix(r, x_rows):
    """out[b] = r @ x_rows[b];  r: (Mo, K), x_rows: (B, K, N) -> (B, Mo, N)."""
    bsz, k, n = x_rows.shape
    mo = r.shape[0]
    itemsize = jnp.dtype(x_rows.dtype).itemsize
    tm = _pick_tile(mo, n * itemsize, align=8, want_steps=2)
    tn = _pick_tile(n, (k + tm) * itemsize, align=128, want_steps=1)
    step_bytes = _block_bytes([(tm, k), (1, k, tn), (1, tm, tn)], itemsize)
    return pl.pallas_call(
        _rowmix_kernel,
        out_shape=jax.ShapeDtypeStruct((bsz, mo, n), x_rows.dtype),
        grid=(bsz, mo // tm, n // tn),
        in_specs=[
            pl.BlockSpec((tm, k), lambda b, i, j: (i, 0)),
            pl.BlockSpec((1, k, tn), lambda b, i, j: (b, 0, j)),
        ],
        out_specs=pl.BlockSpec((1, tm, tn), lambda b, i, j: (b, i, j)),
        compiler_params=_mosaic_params(3, step_bytes),
    )(r, x_rows)


def _up_consumer(x1, ys_tall, rw, wa, bias):
    """swish(conv1x1(x1; wa) + Winterp(ys_tall; rw) + bias), tiled over H."""
    b, h, w, cin = x1.shape
    ws = ys_tall.shape[2]
    cout = wa.shape[1]
    itemsize = jnp.dtype(x1.dtype).itemsize
    th = _pick_tile(h, (w * cin + ws * cout + w * cout) * itemsize,
                    align=1, want_steps=2)
    step_bytes = _block_bytes(
        [(1, th, w, cin), (1, th, ws, cout), (w, ws), (cin, cout), (1, cout),
         (1, th, w, cout)], itemsize)
    return pl.pallas_call(
        _up_consumer_kernel,
        out_shape=jax.ShapeDtypeStruct((b, h, w, cout), x1.dtype),
        grid=(b, h // th),
        in_specs=[
            pl.BlockSpec((1, th, w, cin), lambda bi, i: (bi, i, 0, 0)),
            pl.BlockSpec((1, th, ws, cout), lambda bi, i: (bi, i, 0, 0)),
            pl.BlockSpec((w, ws), lambda bi, i: (0, 0)),
            pl.BlockSpec((cin, cout), lambda bi, i: (0, 0)),
            pl.BlockSpec((1, cout), lambda bi, i: (0, 0)),
        ],
        out_specs=pl.BlockSpec((1, th, w, cout), lambda bi, i: (bi, i, 0, 0)),
        compiler_params=_mosaic_params(2, step_bytes),
    )(x1, ys_tall, rw, wa, bias)


def _down_consumer(x1, x2, xd_tall, dw, w, bias):
    """swish((x1 + x2 + Wstage(xd_tall; dw)) @ w + bias), tiled over H."""
    b, h, wsm, c = x1.shape
    wbig = xd_tall.shape[2]
    cout = w.shape[1]
    itemsize = jnp.dtype(x1.dtype).itemsize
    th = _pick_tile(h, (2 * wsm * c + wbig * c + wsm * cout) * itemsize,
                    align=1, want_steps=2)
    step_bytes = _block_bytes(
        [(1, th, wsm, c), (1, th, wsm, c), (1, th, wbig, c), (wsm, wbig),
         (c, cout), (1, cout), (1, th, wsm, cout)], itemsize)
    return pl.pallas_call(
        _down_consumer_kernel,
        out_shape=jax.ShapeDtypeStruct((b, h, wsm, cout), x1.dtype),
        grid=(b, h // th),
        in_specs=[
            pl.BlockSpec((1, th, wsm, c), lambda bi, i: (bi, i, 0, 0)),
            pl.BlockSpec((1, th, wsm, c), lambda bi, i: (bi, i, 0, 0)),
            pl.BlockSpec((1, th, wbig, c), lambda bi, i: (bi, i, 0, 0)),
            pl.BlockSpec((wsm, wbig), lambda bi, i: (0, 0)),
            pl.BlockSpec((c, cout), lambda bi, i: (0, 0)),
            pl.BlockSpec((1, cout), lambda bi, i: (0, 0)),
        ],
        out_specs=pl.BlockSpec((1, th, wsm, cout), lambda bi, i: (bi, i, 0, 0)),
        compiler_params=_mosaic_params(2, step_bytes),
    )(x1, x2, xd_tall, dw, w, bias)


# ----------------------------------------------------------------------------
# Per-axis resampling operators (host-side numpy, shape-only).
# ----------------------------------------------------------------------------

def _interp_index_weights(out_size, in_size):
    """Indices/weights for 1-D linear interpolation with align_corners=True."""
    if out_size == 1:
        z = np.zeros((1,), np.int32)
        return z, z.copy(), np.zeros((1,), np.float32)
    pos = np.arange(out_size, dtype=np.float64) * (float(in_size - 1) / float(out_size - 1))
    i0 = np.clip(np.floor(pos).astype(np.int32), 0, in_size - 1)
    i1 = np.minimum(i0 + 1, in_size - 1)
    frac = (pos - i0).astype(np.float32)
    return i0, i1, frac


def _interp_matrix(out_size, in_size):
    """(out, in) matrix for bilinear / align_corners=True resizing along one axis."""
    i0, i1, frac = _interp_index_weights(out_size, in_size)
    m = np.zeros((out_size, in_size), np.float32)
    rows = np.arange(out_size)
    np.add.at(m, (rows, i0), 1.0 - frac)
    np.add.at(m, (rows, i1), frac)
    return m


def _avgpool_matrix(in_size):
    """(out, in) matrix for one axis of avg_pool2d(3, stride=2, padding=1,
    count_include_pad=True); the 2-D pool is the separable product of two of these."""
    out_size = (in_size - 1) // 2 + 1
    m = np.zeros((out_size, in_size), np.float32)
    for o in range(out_size):
        for k in range(3):
            i = 2 * o - 1 + k
            if 0 <= i < in_size:
                m[o, i] += 1.0 / 3.0
    return m


def _down_axis_matrix(out_size, in_size):
    """One axis of bilinear(align_corners=True) ∘ avg_pool2d(3,2,1): (out, in)."""
    pool = _avgpool_matrix(in_size)
    return _interp_matrix(out_size, pool.shape[0]) @ pool


# ----------------------------------------------------------------------------
# Parameter preparation: split concat-convs, fold BN, pre-transpose, pre-cast.
# ----------------------------------------------------------------------------

def _split_concat_conv(w, b, dtype):
    """torch Conv2d(2C->C, 1x1): w (C, 2C), b (C,) -> (Wa^T, Wb^T, b_row) in dtype."""
    cout, cin2 = w.shape
    c = cin2 // 2
    return (jnp.transpose(w[:, :c]).astype(dtype),
            jnp.transpose(w[:, c:]).astype(dtype),
            b.reshape(1, cout).astype(dtype))


def _fold_bn_conv(w, b, gamma, beta, mean, var, eps, dtype):
    """Fold eval-mode BatchNorm into the 1x1 conv; returns (W_eff^T, b_row) in dtype."""
    scale = gamma / jnp.sqrt(var + eps)
    w_eff = w * scale[:, None]
    b_eff = (b - mean) * scale + beta
    return jnp.transpose(w_eff).astype(dtype), b_eff.reshape(1, -1).astype(dtype)


# ----------------------------------------------------------------------------
# Full _BIFPN_Layer forward built from the Pallas kernels.
# ----------------------------------------------------------------------------

def bifpn_layer_forward_cl(p3, p4, p5, p6, p7, params, last_pool=True, eps=1e-5):
    """Channels-last (B, H, W, C) inputs/outputs.  Use this entry point when
    stacking BiFPN layers so NCHW<->NHWC transposes happen once per network."""
    dt = p3.dtype

    wa67, wb67, b67 = _split_concat_conv(*params["convp67"], dtype=dt)
    wa56, wb56, b56 = _split_concat_conv(*params["convp56"], dtype=dt)
    wa45, wb45, b45 = _split_concat_conv(*params["convp45"], dtype=dt)
    wa34, wb34, b34 = _split_concat_conv(*params["convp34"], dtype=dt)
    w4, b4 = _fold_bn_conv(*params["out4"], eps=eps, dtype=dt)
    w5, b5 = _fold_bn_conv(*params["out5"], eps=eps, dtype=dt)
    w6, b6 = _fold_bn_conv(*params["out6"], eps=eps, dtype=dt)
    w7, b7 = _fold_bn_conv(*params["out7"], eps=eps, dtype=dt)

    h3, w3_ = p3.shape[1:3]
    h4, w4_ = p4.shape[1:3]
    h5, w5_ = p5.shape[1:3]
    h6, w6_ = p6.shape[1:3]

    mat = lambda m: jnp.asarray(m, dtype=dt)
    rh65, rw65 = mat(_interp_matrix(h5, h6)), mat(_interp_matrix(w5_, w6_))
    rh43, rw43 = mat(_interp_matrix(h3, h4)), mat(_interp_matrix(w3_, w4_))
    dh34, dw34 = mat(_down_axis_matrix(h4, h3)), mat(_down_axis_matrix(w4_, w3_))

    def rows(x):        # (B,H,W,C) -> (B,H,W*C): free metadata reshape outside kernels
        b_, hh, ww, cc = x.shape
        return x.reshape(b_, hh, ww * cc)

    def unrows(x, ww):  # (B,Ho,W*C) -> (B,Ho,W,C)
        b_, ho, wc = x.shape
        return x.reshape(b_, ho, ww, wc // ww)

    # ---- top-down path (concat convs; concat never materialized; reassociated W) ----
    p6_mid, y6 = _concat_conv_dual(p6, p7, wa67, wb67, b67, wb56)
    ys6 = unrows(_rowmix(rh65, rows(y6)), w6_)            # H-interp of (p6_mid @ Wb56)
    p5_mid = _up_consumer(p5, ys6, rw65, wa56, b56)

    p4_mid, y4 = _concat_conv_dual(p4, p5, wa45, wb45, b45, wb34)
    ys4 = unrows(_rowmix(rh43, rows(y4)), w4_)            # H-interp of (p4_mid @ Wb34)
    p3_out = _up_consumer(p3, ys4, rw43, wa34, b34)

    # ---- bottom-up output path (residual adds + folded BN conv + swish) ----
    xd3 = unrows(_rowmix(dh34, rows(p3_out)), w3_)        # H stage of pool+resize(p3_out)
    p4_out = _down_consumer(p4, p4_mid, xd3, dw34, w4, b4)
    p5_out = _sum_conv_swish([p5, p5_mid, p4_out], w5, b5)
    if last_pool:
        dh56, dw56 = mat(_down_axis_matrix(h6, h5)), mat(_down_axis_matrix(w6_, w5_))
        xd5 = unrows(_rowmix(dh56, rows(p5_out)), w5_)
        p6_out = _down_consumer(p6, p6_mid, xd5, dw56, w6, b6)
    else:
        p6_out = _sum_conv_swish([p6, p6_mid, p5_out], w6, b6)
    p7_out = _sum_conv_swish([p7, p6_out], w7, b7)

    return [p3_out, p4_out, p5_out, p6_out, p7_out]


def bifpn_layer_forward(p3, p4, p5, p6, p7, params, last_pool=True, eps=1e-5):
    """NCHW wrapper (matches the PyTorch module interface): converts to
    channels-last once at the boundary and back once for the outputs."""
    to_cl = lambda x: jnp.transpose(x, (0, 2, 3, 1))
    to_nchw = lambda x: jnp.transpose(x, (0, 3, 1, 2))
    outs = bifpn_layer_forward_cl(to_cl(p3), to_cl(p4), to_cl(p5), to_cl(p6),
                                  to_cl(p7), params, last_pool=last_pool, eps=eps)
    return [to_nchw(o) for o in outs]


# ----------------------------------------------------------------------------
# Pure-JAX reference matching the PyTorch module (eval-mode BN).
# ----------------------------------------------------------------------------

def _bilinear_resize_ref(x, out_hw):
    oh, ow = out_hw
    ih0, ih1, fh = _interp_index_weights(oh, x.shape[2])
    iw0, iw1, fw = _interp_index_weights(ow, x.shape[3])
    fh = jnp.asarray(fh)[None, None, :, None]
    xh = (jnp.take(x, jnp.asarray(ih0), axis=2) * (1.0 - fh)
          + jnp.take(x, jnp.asarray(ih1), axis=2) * fh)
    fw = jnp.asarray(fw)[None, None, None, :]
    return (jnp.take(xh, jnp.asarray(iw0), axis=3) * (1.0 - fw)
            + jnp.take(xh, jnp.asarray(iw1), axis=3) * fw)


def _avg_pool_3x3_s2_p1_ref(x):
    s = jax.lax.reduce_window(x, jnp.asarray(0.0, x.dtype), jax.lax.add,
                              (1, 1, 3, 3), (1, 1, 2, 2),
                              ((0, 0), (0, 0), (1, 1), (1, 1)))
    return s / 9.0


def bifpn_layer_ref(p3, p4, p5, p6, p7, params, last_pool=True, eps=1e-5):
    def swish(x):
        return x * jax.nn.sigmoid(x)

    def conv1x1(x, w, b):
        return jnp.einsum("bchw,oc->bohw", x, w) + b[None, :, None, None]

    def concat_conv(x1, x2, w, b):
        return swish(conv1x1(jnp.concatenate([x1, x2], axis=1), w, b))

    def out_block(x, p):
        w, b, gamma, beta, mean, var = p
        y = conv1x1(x, w, b)
        y = (gamma[None, :, None, None] * (y - mean[None, :, None, None])
             / jnp.sqrt(var[None, :, None, None] + eps) + beta[None, :, None, None])
        return swish(y)

    p6_mid = concat_conv(p6, p7, *params["convp67"])
    p5_mid = concat_conv(p5, _bilinear_resize_ref(p6_mid, p5.shape[2:]), *params["convp56"])
    p4_mid = concat_conv(p4, p5, *params["convp45"])
    p3_out = concat_conv(p3, _bilinear_resize_ref(p4_mid, p3.shape[2:]), *params["convp34"])
    p4_out = out_block(
        p4 + p4_mid + _bilinear_resize_ref(_avg_pool_3x3_s2_p1_ref(p3_out), p4.shape[2:]),
        params["out4"])
    p5_out = out_block(p5 + p5_mid + p4_out, params["out5"])
    if last_pool:
        p6_out = out_block(
            p6 + p6_mid + _bilinear_resize_ref(_avg_pool_3x3_s2_p1_ref(p5_out), p6.shape[2:]),
            params["out6"])
    else:
        p6_out = out_block(p6 + p6_mid + p5_out, params["out6"])
    p7_out = out_block(p7 + p6_out, params["out7"])
    return [p3_out, p4_out, p5_out, p6_out, p7_out]


if __name__ == "__main__":
    # Small shapes consistent with the module's spatial contracts:
    # p4/p5 share a resolution, p6/p7 share a resolution, p3 is 2x p4.
    B, C = 2, 8
    sizes = {"p3": (16, 16), "p4": (8, 8), "p5": (8, 8), "p6": (4, 4), "p7": (4, 4)}

    key = jax.random.PRNGKey(0)
    keys = iter(jax.random.split(key, 64))

    def feat(hw):
        return jax.random.normal(next(keys), (B, C) + hw, dtype=jnp.float32)

    p3, p4, p5 = feat(sizes["p3"]), feat(sizes["p4"]), feat(sizes["p5"])
    p6, p7 = feat(sizes["p6"]), feat(sizes["p7"])

    def concat_conv_params():
        w = 0.1 * jax.random.normal(next(keys), (C, 2 * C), jnp.float32)
        b = 0.1 * jax.random.normal(next(keys), (C,), jnp.float32)
        return w, b

    def out_params():
        w = 0.1 * jax.random.normal(next(keys), (C, C), jnp.float32)
        b = 0.1 * jax.random.normal(next(keys), (C,), jnp.float32)
        gamma = 1.0 + 0.1 * jax.random.normal(next(keys), (C,), jnp.float32)
        beta = 0.1 * jax.random.normal(next(keys), (C,), jnp.float32)
        mean = 0.1 * jax.random.normal(next(keys), (C,), jnp.float32)
        var = jax.random.uniform(next(keys), (C,), jnp.float32, 0.5, 1.5)
        return w, b, gamma, beta, mean, var

    params = {
        "convp67": concat_conv_params(),
        "convp56": concat_conv_params(),
        "convp45": concat_conv_params(),
        "convp34": concat_conv_params(),
        "out4": out_params(),
        "out5": out_params(),
        "out6": out_params(),
        "out7": out_params(),
    }

    outs = bifpn_layer_forward(p3, p4, p5, p6, p7, params, last_pool=True)
    outs = jax.block_until_ready(outs)

    refs = bifpn_layer_ref(p3, p4, p5, p6, p7, params, last_pool=True)
    names = ["p3_out", "p4_out", "p5_out", "p6_out", "p7_out"]
    for name, got, want in zip(names, outs, refs):
        assert got.shape == want.shape, f"{name}: shape {got.shape} vs {want.shape}"
        assert jnp.allclose(got, want, atol=2e-2, rtol=2e-2), (
            f"{name}: max abs diff {float(jnp.max(jnp.abs(got - want)))}")

    print("KERNEL_OK")
</pallas_src>

<mosaic_0001>
module attributes {stable_mosaic.version = 11 : i64} {
  func.func @_concat_conv_dual_kernel(%arg0: i32, %arg1: memref<16x8xf32, #tpu.memory_space<vmem>>, %arg2: memref<16x8xf32, #tpu.memory_space<vmem>>, %arg3: memref<8x8xf32, #tpu.memory_space<vmem>>, %arg4: memref<8x8xf32, #tpu.memory_space<vmem>>, %arg5: memref<1x8xf32, #tpu.memory_space<vmem>>, %arg6: memref<8x8xf32, #tpu.memory_space<vmem>>, %arg7: memref<16x8xf32, #tpu.memory_space<vmem>>, %arg8: memref<16x8xf32, #tpu.memory_space<vmem>>) attributes {dimension_semantics = [#tpu.dimension_semantics<parallel>], iteration_bounds = array<i64: 2>, scalar_prefetch = 0 : i64, scratch_operands = 0 : i64, tpu.core_type = #tpu.core_type<tc>, window_params = [{transform_indices = @transform_0, window_bounds = array<i64: 16, 8>}, {transform_indices = @transform_1, window_bounds = array<i64: 16, 8>}, {pipeline_mode = #tpu.pipeline_mode<synchronous>, transform_indices = @transform_2, window_bounds = array<i64: 8, 8>}, {pipeline_mode = #tpu.pipeline_mode<synchronous>, transform_indices = @transform_3, window_bounds = array<i64: 8, 8>}, {pipeline_mode = #tpu.pipeline_mode<synchronous>, transform_indices = @transform_4, window_bounds = array<i64: 1, 8>}, {pipeline_mode = #tpu.pipeline_mode<synchronous>, transform_indices = @transform_5, window_bounds = array<i64: 8, 8>}, {transform_indices = @transform_6, window_bounds = array<i64: 16, 8>}, {transform_indices = @transform_7, window_bounds = array<i64: 16, 8>}]} {
    %c0 = arith.constant 0 : index
    %c0_0 = arith.constant 0 : index
    %0 = vector.load %arg1[%c0, %c0_0] : memref<16x8xf32, #tpu.memory_space<vmem>>, vector<16x8xf32>
    %c0_1 = arith.constant 0 : index
    %c0_2 = arith.constant 0 : index
    %1 = vector.load %arg3[%c0_1, %c0_2] : memref<8x8xf32, #tpu.memory_space<vmem>>, vector<8x8xf32>
    %cst = arith.constant dense<0.000000e+00> : vector<16x8xf32>
    %2 = tpu.matmul %0, %1, %cst {dimension_numbers = #tpu.dot_dimension_numbers<[1], [0], [0], [1], [0, 0, 1, 1], [], []>} : vector<16x8xf32>, vector<8x8xf32>, vector<16x8xf32> -> vector<16x8xf32>
    %c0_3 = arith.constant 0 : index
    %c0_4 = arith.constant 0 : index
    %3 = vector.load %arg2[%c0_3, %c0_4] : memref<16x8xf32, #tpu.memory_space<vmem>>, vector<16x8xf32>
    %c0_5 = arith.constant 0 : index
    %c0_6 = arith.constant 0 : index
    %4 = vector.load %arg4[%c0_5, %c0_6] : memref<8x8xf32, #tpu.memory_space<vmem>>, vector<8x8xf32>
    %cst_7 = arith.constant dense<0.000000e+00> : vector<16x8xf32>
    %5 = tpu.matmul %3, %4, %cst_7 {dimension_numbers = #tpu.dot_dimension_numbers<[1], [0], [0], [1], [0, 0, 1, 1], [], []>} : vector<16x8xf32>, vector<8x8xf32>, vector<16x8xf32> -> vector<16x8xf32>
    %6 = arith.addf %2, %5 : vector<16x8xf32>
    %c0_8 = arith.constant 0 : index
    %c0_9 = arith.constant 0 : index
    %7 = vector.load %arg5[%c0_8, %c0_9] : memref<1x8xf32, #tpu.memory_space<vmem>>, vector<1x8xf32>
    %8 = vector.broadcast %7 : vector<1x8xf32> to vector<16x8xf32>
    %9 = arith.addf %6, %8 : vector<16x8xf32>
    %10 = arith.negf %9 : vector<16x8xf32>
    %11 = math.exp %10 : vector<16x8xf32>
    %cst_10 = arith.constant 1.000000e+00 : f32
    %12 = vector.broadcast %cst_10 : f32 to vector<16x8xf32>
    %13 = arith.addf %12, %11 : vector<16x8xf32>
    %14 = arith.divf %12, %13 : vector<16x8xf32>
    %15 = arith.mulf %9, %14 : vector<16x8xf32>
    %c0_11 = arith.constant 0 : index
    %c0_12 = arith.constant 0 : index
    %16 = vector.load %arg7[%c0_11, %c0_12] : memref<16x8xf32, #tpu.memory_space<vmem>>, vector<16x8xf32>
    tpu.vector_store %arg7[%c0_11, %c0_12], %15 {strides = array<i32>} : memref<16x8xf32, #tpu.memory_space<vmem>>, vector<16x8xf32>,
    %c0_13 = arith.constant 0 : index
    %c0_14 = arith.constant 0 : index
    %17 = vector.load %arg6[%c0_13, %c0_14] : memref<8x8xf32, #tpu.memory_space<vmem>>, vector<8x8xf32>
    %cst_15 = arith.constant dense<0.000000e+00> : vector<16x8xf32>
    %18 = tpu.matmul %15, %17, %cst_15 {dimension_numbers = #tpu.dot_dimension_numbers<[1], [0], [0], [1], [0, 0, 1, 1], [], []>} : vector<16x8xf32>, vector<8x8xf32>, vector<16x8xf32> -> vector<16x8xf32>
    %c0_16 = arith.constant 0 : index
    %c0_17 = arith.constant 0 : index
    %19 = vector.load %arg8[%c0_16, %c0_17] : memref<16x8xf32, #tpu.memory_space<vmem>>, vector<16x8xf32>
    tpu.vector_store %arg8[%c0_16, %c0_17], %18 {strides = array<i32>} : memref<16x8xf32, #tpu.memory_space<vmem>>, vector<16x8xf32>,
    return
  }
  func.func @transform_0(%arg0: i32) -> (i32, i32) {
    %c0_i32 = arith.constant 0 : i32
    %c0_i32_0 = arith.constant 0 : i32
    return %arg0, %c0_i32 : i32, i32
  }
  func.func @transform_1(%arg0: i32) -> (i32, i32) {
    %c0_i32 = arith.constant 0 : i32
    %c0_i32_0 = arith.constant 0 : i32
    return %arg0, %c0_i32 : i32, i32
  }
  func.func @transform_2(%arg0: i32) -> (i32, i32) {
    %c0_i32 = arith.constant 0 : i32
    %c0_i32_0 = arith.constant 0 : i32
    %c0_i32_1 = arith.constant 0 : i32
    return %c0_i32, %c0_i32_0 : i32, i32
  }
  func.func @transform_3(%arg0: i32) -> (i32, i32) {
    %c0_i32 = arith.constant 0 : i32
    %c0_i32_0 = arith.constant 0 : i32
    %c0_i32_1 = arith.constant 0 : i32
    return %c0_i32, %c0_i32_0 : i32, i32
  }
  func.func @transform_4(%arg0: i32) -> (i32, i32) {
    %c0_i32 = arith.constant 0 : i32
    %c0_i32_0 = arith.constant 0 : i32
    %c0_i32_1 = arith.constant 0 : i32
    return %c0_i32, %c0_i32_0 : i32, i32
  }
  func.func @transform_5(%arg0: i32) -> (i32, i32) {
    %c0_i32 = arith.constant 0 : i32
    %c0_i32_0 = arith.constant 0 : i32
    %c0_i32_1 = arith.constant 0 : i32
    return %c0_i32, %c0_i32_0 : i32, i32
  }
  func.func @transform_6(%arg0: i32) -> (i32, i32) {
    %c0_i32 = arith.constant 0 : i32
    %c0_i32_0 = arith.constant 0 : i32
    return %arg0, %c0_i32 : i32, i32
  }
  func.func @transform_7(%arg0: i32) -> (i32, i32) {
    %c0_i32 = arith.constant 0 : i32
    %c0_i32_0 = arith.constant 0 : i32
    return %arg0, %c0_i32 : i32, i32
  }
}

</mosaic_0001>

<bundles_post_ra>
// kernel: tpu_custom_call.1
= control target key start
LH: loop header
LB: loop body
LE: loop exit
PB: predicated region body
PF: predicated region fallthrough
CT: control target
= control target key end

     0   :  { %s812_s24 = smov 0   ;;  %s863_s0 = inlined_call_operand.vmem [shape: f32[32,8], index: 0, kind: input, shape index: {}]   ;;  %s864_s1 = inlined_call_operand.vmem [shape: f32[32,8], index: 1, kind: input, shape index: {}]   ;;  %s865_s2 = inlined_call_operand.vmem [shape: f32[8,8], index: 2, kind: input, shape index: {}]   ;;  %s866_s3 = inlined_call_operand.vmem [shape: f32[8,8], index: 3, kind: input, shape index: {}]   ;;  %s867_s4 = inlined_call_operand.vmem [shape: f32[1,8], index: 4, kind: input, shape index: {}]   ;;  %s868_s5 = inlined_call_operand.vmem [shape: f32[8,8], index: 5, kind: input, shape index: {}]   ;;  %s869_s6 = inlined_call_operand.vmem [shape: f32[32,8], index: 6, kind: output, shape index: {0}]   ;;  %s870_s7 = inlined_call_operand.vmem [shape: f32[32,8], index: 7, kind: output, shape index: {1}]  }
   0x1 LB: > { %s698_s25 = sadd.s32 4294967295, %s770_s24   ;;  %p702_p0 = scmp.ge.s32.totalorder %s770_s24, 1  ;;  %s770_s24 = sphi %s812_s24, %s18_s24  }
   0x2   : > { %p252_p1 = scmp.lt.s32.totalorder %s770_s24, 3 }
   0x4   : > { %p253_p2 = pnand %p702_p0, %p252_p1 }
   0x5   : > { %v323_v0 = vld [vmem:[%s866_s3] sm:$0xff] (!%p253_p2)  ;;  %s703_s28 = sshll.u32 (!%p253_p2), %s698_s25, 1  ;;  %vm324_vm0 = vcmask (!%p253_p2), 64512  }
   0x6   : > { %256 = sbr.rel (%p253_p2) target bundleno = 484 (0x1e4), region = 44  ;;  %v320_v1 = vld [vmem:[%s865_s2] sm:$0xff] (!%p253_p2)  ;;  %731 = vmatprep.subr.mxu0 (!%p253_p2), %v323_v0  ;;  %p295_p3 = scmp.lt.s32.totalorder (!%p253_p2), %s703_s28, 3 }
   0x7   : > { %732 = vmatpush3.msra.mxu0 (!%p253_p2), %v323_v0  ;;  %v512_v6 = vld [vmem:[%s868_s5] sm:$0xff] (!%p253_p2) }
   0x8   : > { %736 = vmatprep.subr.mxu0 (!%p253_p2), %v320_v1  ;;  %741 = vmatprep.subr.mxu1 (!%p253_p2), %v512_v6  ;;  %v715_v7 = vld [vmem:[%s867_s4] ss:$0 sm:$0xff] (!%p253_p2) }
   0x9   : > { %742 = vmatpush3.msra.mxu1 (!%p253_p2), %v512_v6 }
   0xd   : > { %s872_s28 = smov (!%p295_p3, %s703_s28), 3 }
   0xe   : > { %s826_s8 = sshll.u32 %s872_s28, 3 }
   0xf   : > { %s304_s11 = scalar_lea.vmem %s864_s1, %s826_s8  ;;  %s298_s14 = scalar_lea.vmem %s863_s0, %s826_s8 }
  0x10   : > { %v321_v2 = vld [vmem:[%s304_s11] sm:$0xff]  ;;  %v322_v3 = vld [vmem:[%s304_s11 + $0x8] sm:$0xff]  ;;  %s310_s21 = scalar_lea.vmem %s869_s6, %s826_s8  ;;  %s316_s25 = scalar_lea.vmem %s870_s7, %s826_s8 }
  0x11   : > { %v318_v4 = vld [vmem:[%s298_s14] sm:$0xff]  ;;  %733 = vmatprep.mubr.msk.f32.mxu0 %vm324_vm0, %v321_v2  ;;  %v319_v5 = vld [vmem:[%s298_s14 + $0x8] sm:$0xff] }
  0x12   : > { %734 = vmatmul.mubr.msk.f32.vlgmr.msra.gmra.mrb[0].mxu0 %vm324_vm0, %v322_v3 }
  0x13   : > { %737 = vmatpush3.msra.mxu0 %v320_v1  ;;  %738 = vmatprep.mubr.msk.f32.mxu0 %vm324_vm0, %v318_v4 }
  0x1a   : > { %739 = vmatmul.mubr.msk.f32.vlgmr.msra.gmra.mrb[0].mxu0 %vm324_vm0, %v319_v5 }
  0xed   : > { %v740_v8 = vpop.f32.mrb[0].mxu0 }
  0xee   : > { %v495_v9 = vadd.f32 %v740_v8, %v715_v7  ;;  %v478_v10 = vpop.f32.mrb[1].mxu0 }
  0xef   : > { %v494_v11 = vadd.f32 %v715_v7, %v478_v10 }
  0xf0   : > { %v717_v12 = vmul.f32 -1.442695, %v495_v9 }
  0xf1   : > { %v716_v13 = vmul.f32 -1.442695, %v494_v11 }
  0xf2   : > { %756 = vpow2.f32 %v717_v12 }
  0xf3   : > { %758 = vpow2.f32 %v716_v13 }
  0xfc   : > { %v757_v14 = vpop.eup %756 }
  0xfd   : > { %v759_v15 = vpop.eup %758  ;;  %v503_v16 = vadd.f32 1.0, %v757_v14 }
  0xfe   : > { %v502_v17 = vadd.f32 1.0, %v759_v15 }
  0xff   : > { %760 = vrcp.f32 %v503_v16 }
 0x100   : > { %762 = vrcp.f32 %v502_v17 }
 0x109   : > { %v761_v18 = vpop.eup %760 }
 0x10a   : > { %v763_v19 = vpop.eup %762  ;;  %v509_v21 = vmul.f32 %v761_v18, %v495_v9 }
 0x10b   : > { %v508_v20 = vmul.f32 %v763_v19, %v494_v11 }
 0x10c   : > { %511 = vst.msk [vmem:[%s310_s21 + $0x8] sm:$0xff] %vm324_vm0, %v509_v21 }
 0x10d   : > { %510 = vst.msk [vmem:[%s310_s21] sm:$0xff] %vm324_vm0, %v508_v20  ;;  %743 = vmatprep.mubr.msk.f32.mxu1 %vm324_vm0, %v508_v20 }
 0x10e   : > { %744 = vmatmul.mubr.msk.f32.vlgmr.msra.gmra.mrb[0].mxu1 %vm324_vm0, %v509_v21 }
 0x1e1   : > { %v745_v22 = vpop.f32.mrb[0].mxu1 }
 0x1e2   : > { %v585_v23 = vpop.f32.mrb[1].mxu1  ;;  %595 = vst.msk [vmem:[%s316_s25 + $0x8] sm:$0xff] %vm324_vm0, %v745_v22 }
 0x1e3   : > { %594 = vst.msk [vmem:[%s316_s25] sm:$0xff] %vm324_vm0, %v585_v23 }
 0x1e4 PF: > { %s18_s24 = sadd.s32 1, %s770_s24  }
 0x1e5   : > { %p15_p4 = scmp.ge.s32.totalorder %s18_s24, 4  }
 0x1e7   :  { %17 = sbr.rel (!%p15_p4) target bundleno = 1 (0x1), region = 89 }

</bundles_post_ra>
